<compile_context>
chip_gen: v6e
topology: v6e:2x2x1
jax: 0.10.0
libtpu: 0.0.40
codegen_flags: <defaults>
</compile_context>

<pallas_src>
import functools

import jax
import jax.numpy as jnp
from jax import lax
from jax.experimental import pallas as pl
from jax.experimental.pallas import tpu as pltpu


def _rot_sublanes(x, shift):
    """Circular rotate along axis 0 (sublanes), jnp.roll semantics, static shift."""
    L = x.shape[0]
    shift = shift % L
    if shift == 0:
        return x
    return pltpu.roll(x, shift=shift, axis=0)


def _moving_avg_lanes(x, kernel_size, row_idx):
    """Replicate-pad moving average along axis 0 (stride 1, odd kernel_size).

    x: (L, N) float32 — each lane (column) is an independent series.
    row_idx: (L, N) int32 iota along axis 0 (hoisted by the caller).
    """
    L = x.shape[0]
    p = (kernel_size - 1) // 2
    if p == 0:
        return x
    first = jnp.broadcast_to(x[0:1, :], x.shape)      # replicate-pad value (front)
    last = jnp.broadcast_to(x[L - 1:L, :], x.shape)   # replicate-pad value (end)
    acc = x
    for s in range(1, p + 1):
        # fwd[i] = x[min(i + s, L - 1)]
        fwd = _rot_sublanes(x, -s)                    # fwd[i] = x[(i + s) % L]
        fwd = jnp.where(row_idx >= L - s, last, fwd)  # clamp wrapped tail rows
        # bwd[i] = x[max(i - s, 0)]
        bwd = _rot_sublanes(x, s)                     # bwd[i] = x[(i - s) % L]
        bwd = jnp.where(row_idx < s, first, bwd)      # clamp wrapped head rows
        acc = acc + fwd + bwd
    return acc * jnp.float32(1.0 / kernel_size)


def _series_decomp_kernel(x_ref, res_ref, trend_ref, seas_ref, *,
                          trend_size, seasonal_size):
    x = x_ref[...].astype(jnp.float32)                       # (L, N_block)
    row = lax.broadcasted_iota(jnp.int32, x.shape, 0)        # row index along L
    trend = _moving_avg_lanes(x, trend_size, row)
    x_ = x - trend
    seasonal = _moving_avg_lanes(x_, seasonal_size, row)
    res = x_ - seasonal
    res_ref[...] = res.astype(res_ref.dtype)
    trend_ref[...] = trend.astype(trend_ref.dtype)
    seas_ref[...] = seasonal.astype(seas_ref.dtype)


def _series_decomp_3d(x, trend_size, seasonal_size, *, lane_block, out_dtype):
    B, L, C = x.shape
    N = B * C

    # Lane-dense layout: (B, L, C) -> (L, B*C).  The moving average runs along
    # sublanes; replicate padding is per-lane (per (b, c) series), so folding B
    # and C into lanes is semantics-preserving.
    x2 = jnp.transpose(x, (1, 0, 2)).reshape(L, N)

    # Lane tile: a multiple of 128 (unmasked stores), kept small enough that
    # the double-buffered (1 input + 3 output) f32 blocks stay a few MiB each.
    nb = lane_block
    while nb > 128 and L * nb * 4 > (2 << 20):
        nb //= 2
    if N <= nb:
        n_block = n_padded = N            # single block == full (unpadded) width
    else:
        n_block = nb
        n_padded = pl.cdiv(N, n_block) * n_block
        if n_padded != N:
            x2 = jnp.pad(x2, ((0, 0), (0, n_padded - N)))
    grid = (n_padded // n_block,)

    blk = pl.BlockSpec((L, n_block), lambda j: (0, j))
    block_bytes = L * n_block * 4
    # 1 input + 3 outputs, double-buffered, plus headroom for in-kernel temps.
    vmem_limit = int(min(64 << 20, max(32 << 20, 16 * block_bytes)))

    kernel = functools.partial(_series_decomp_kernel,
                               trend_size=trend_size, seasonal_size=seasonal_size)
    res2, trend2, seas2 = pl.pallas_call(
        kernel,
        out_shape=tuple(jax.ShapeDtypeStruct((L, n_padded), out_dtype)
                        for _ in range(3)),
        grid=grid,
        in_specs=[blk],
        out_specs=(blk, blk, blk),
        compiler_params=pltpu.CompilerParams(
            dimension_semantics=("parallel",),
            vmem_limit_bytes=vmem_limit),
    )(x2)

    def _back(y):
        return jnp.transpose(y[:, :N].reshape(L, B, C), (1, 0, 2))

    return _back(res2), _back(trend2), _back(seas2)


def series_decomp(x, trend_size, seasonal_size, *, lane_block=512, out_dtype=None):
    """Series decomposition.  x: (B, L, C) or (B, L).

    Returns (res, trend, seasonal), each shaped like x — matching the PyTorch
    series_decomp module.  `out_dtype` optionally narrows the stored outputs
    (e.g. bf16) to cut HBM write traffic; in-kernel accumulation is always f32.
    """
    assert trend_size % 2 == 1 and seasonal_size % 2 == 1, (
        "odd kernel sizes required (PyTorch module only works shape-wise with odd sizes)")
    out_dtype = x.dtype if out_dtype is None else out_dtype

    if x.ndim == 2:
        # PyTorch 2-D branch: each row is a series along dim 1 == the 3-D case
        # with a single channel.
        res, trend, seas = _series_decomp_3d(
            x[:, :, None], trend_size, seasonal_size,
            lane_block=lane_block, out_dtype=out_dtype)
        return res[:, :, 0], trend[:, :, 0], seas[:, :, 0]

    assert x.ndim == 3, "expected (B, L, C) or (B, L)"
    return _series_decomp_3d(x, trend_size, seasonal_size,
                             lane_block=lane_block, out_dtype=out_dtype)


# ---------------------------------------------------------------------------
# Pure-JAX reference (mirrors the PyTorch module) for correctness checking.
# ---------------------------------------------------------------------------
def _moving_avg_ref(x, kernel_size):
    pad = (kernel_size - 1) // 2
    front = jnp.repeat(x[:, 0:1, :], pad, axis=1)
    end = jnp.repeat(x[:, -1:, :], pad, axis=1)
    xp = jnp.concatenate([front, x, end], axis=1)
    L = x.shape[1]
    windows = jnp.stack([xp[:, j:j + L, :] for j in range(kernel_size)], axis=0)
    return jnp.mean(windows, axis=0)


def _series_decomp_ref(x, trend_size, seasonal_size):
    trend = _moving_avg_ref(x, trend_size)
    x_ = x - trend
    seasonal = _moving_avg_ref(x_, seasonal_size)
    res = x_ - seasonal
    return res, trend, seasonal


if __name__ == "__main__":
    B, L, C = 2, 16, 8
    trend_size, seasonal_size = 7, 3   # odd kernel sizes (see note above)

    key = jax.random.PRNGKey(0)
    x = jax.random.normal(key, (B, L, C), dtype=jnp.float32)

    res, trend, seasonal = series_decomp(x, trend_size, seasonal_size)
    jax.block_until_ready((res, trend, seasonal))

    res_r, trend_r, seas_r = _series_decomp_ref(x, trend_size, seasonal_size)
    assert jnp.allclose(trend, trend_r, atol=1e-5, rtol=1e-5)
    assert jnp.allclose(seasonal, seas_r, atol=1e-5, rtol=1e-5)
    assert jnp.allclose(res, res_r, atol=1e-5, rtol=1e-5)

    # Also exercise the 2-D branch of the module.
    x2d = jax.random.normal(jax.random.PRNGKey(1), (4, 24), dtype=jnp.float32)
    r2, t2, s2 = series_decomp(x2d, trend_size, seasonal_size)
    jax.block_until_ready((r2, t2, s2))
    r2r, t2r, s2r = _series_decomp_ref(x2d[:, :, None], trend_size, seasonal_size)
    assert jnp.allclose(t2, t2r[:, :, 0], atol=1e-5, rtol=1e-5)
    assert jnp.allclose(s2, s2r[:, :, 0], atol=1e-5, rtol=1e-5)
    assert jnp.allclose(r2, r2r[:, :, 0], atol=1e-5, rtol=1e-5)

    print("KERNEL_OK")
</pallas_src>

<mosaic_0001>
module attributes {stable_mosaic.version = 11 : i64} {
  func.func @_series_decomp_kernel(%arg0: i32, %arg1: memref<16x16xf32, #tpu.memory_space<vmem>>, %arg2: memref<16x16xf32, #tpu.memory_space<vmem>>, %arg3: memref<16x16xf32, #tpu.memory_space<vmem>>, %arg4: memref<16x16xf32, #tpu.memory_space<vmem>>) attributes {dimension_semantics = [#tpu.dimension_semantics<parallel>], iteration_bounds = array<i64: 1>, scalar_prefetch = 0 : i64, scratch_operands = 0 : i64, tpu.core_type = #tpu.core_type<tc>, window_params = [{transform_indices = @transform_0, window_bounds = array<i64: 16, 16>}, {transform_indices = @transform_1, window_bounds = array<i64: 16, 16>}, {transform_indices = @transform_2, window_bounds = array<i64: 16, 16>}, {transform_indices = @transform_3, window_bounds = array<i64: 16, 16>}]} {
    %c0 = arith.constant 0 : index
    %c0_0 = arith.constant 0 : index
    %0 = vector.load %arg1[%c0, %c0_0] : memref<16x16xf32, #tpu.memory_space<vmem>>, vector<16x16xf32>
    %1 = tpu.iota {dimensions = array<i32: 0>} : vector<16x16xi32>
    %2 = vector.extract_strided_slice %0 {offsets = [0, 0], sizes = [1, 16], strides = [1, 1]} : vector<16x16xf32> to vector<1x16xf32>
    %3 = vector.shape_cast %2 : vector<1x16xf32> to vector<1x16xf32>
    %4 = vector.broadcast %3 : vector<1x16xf32> to vector<16x16xf32>
    %5 = vector.extract_strided_slice %0 {offsets = [15, 0], sizes = [1, 16], strides = [1, 1]} : vector<16x16xf32> to vector<1x16xf32>
    %6 = vector.shape_cast %5 : vector<1x16xf32> to vector<1x16xf32>
    %7 = vector.broadcast %6 : vector<1x16xf32> to vector<16x16xf32>
    %c15_i32 = arith.constant 15 : i32
    %8 = tpu.dynamic_rotate %0 by %c15_i32 dim 0 : vector<16x16xf32>, i32 -> vector<16x16xf32>
    %c15_i32_1 = arith.constant 15 : i32
    %9 = vector.broadcast %c15_i32_1 : i32 to vector<16x16xi32>
    %10 = arith.cmpi sge, %1, %9 : vector<16x16xi32>
    %11 = arith.select %10, %7, %8 : vector<16x16xi1>, vector<16x16xf32>
    %c1_i32 = arith.constant 1 : i32
    %12 = tpu.dynamic_rotate %0 by %c1_i32 dim 0 : vector<16x16xf32>, i32 -> vector<16x16xf32>
    %c1_i32_2 = arith.constant 1 : i32
    %13 = vector.broadcast %c1_i32_2 : i32 to vector<16x16xi32>
    %14 = arith.cmpi slt, %1, %13 : vector<16x16xi32>
    %15 = arith.select %14, %4, %12 : vector<16x16xi1>, vector<16x16xf32>
    %16 = arith.addf %0, %11 : vector<16x16xf32>
    %17 = arith.addf %16, %15 : vector<16x16xf32>
    %c14_i32 = arith.constant 14 : i32
    %18 = tpu.dynamic_rotate %0 by %c14_i32 dim 0 : vector<16x16xf32>, i32 -> vector<16x16xf32>
    %c14_i32_3 = arith.constant 14 : i32
    %19 = vector.broadcast %c14_i32_3 : i32 to vector<16x16xi32>
    %20 = arith.cmpi sge, %1, %19 : vector<16x16xi32>
    %21 = arith.select %20, %7, %18 : vector<16x16xi1>, vector<16x16xf32>
    %c2_i32 = arith.constant 2 : i32
    %22 = tpu.dynamic_rotate %0 by %c2_i32 dim 0 : vector<16x16xf32>, i32 -> vector<16x16xf32>
    %c2_i32_4 = arith.constant 2 : i32
    %23 = vector.broadcast %c2_i32_4 : i32 to vector<16x16xi32>
    %24 = arith.cmpi slt, %1, %23 : vector<16x16xi32>
    %25 = arith.select %24, %4, %22 : vector<16x16xi1>, vector<16x16xf32>
    %26 = arith.addf %17, %21 : vector<16x16xf32>
    %27 = arith.addf %26, %25 : vector<16x16xf32>
    %c13_i32 = arith.constant 13 : i32
    %28 = tpu.dynamic_rotate %0 by %c13_i32 dim 0 : vector<16x16xf32>, i32 -> vector<16x16xf32>
    %c13_i32_5 = arith.constant 13 : i32
    %29 = vector.broadcast %c13_i32_5 : i32 to vector<16x16xi32>
    %30 = arith.cmpi sge, %1, %29 : vector<16x16xi32>
    %31 = arith.select %30, %7, %28 : vector<16x16xi1>, vector<16x16xf32>
    %c3_i32 = arith.constant 3 : i32
    %32 = tpu.dynamic_rotate %0 by %c3_i32 dim 0 : vector<16x16xf32>, i32 -> vector<16x16xf32>
    %c3_i32_6 = arith.constant 3 : i32
    %33 = vector.broadcast %c3_i32_6 : i32 to vector<16x16xi32>
    %34 = arith.cmpi slt, %1, %33 : vector<16x16xi32>
    %35 = arith.select %34, %4, %32 : vector<16x16xi1>, vector<16x16xf32>
    %36 = arith.addf %27, %31 : vector<16x16xf32>
    %37 = arith.addf %36, %35 : vector<16x16xf32>
    %cst = arith.constant 0.142857149 : f32
    %38 = vector.broadcast %cst : f32 to vector<16x16xf32>
    %39 = arith.mulf %37, %38 : vector<16x16xf32>
    %40 = arith.subf %0, %39 : vector<16x16xf32>
    %41 = vector.extract_strided_slice %40 {offsets = [0, 0], sizes = [1, 16], strides = [1, 1]} : vector<16x16xf32> to vector<1x16xf32>
    %42 = vector.shape_cast %41 : vector<1x16xf32> to vector<1x16xf32>
    %43 = vector.broadcast %42 : vector<1x16xf32> to vector<16x16xf32>
    %44 = vector.extract_strided_slice %40 {offsets = [15, 0], sizes = [1, 16], strides = [1, 1]} : vector<16x16xf32> to vector<1x16xf32>
    %45 = vector.shape_cast %44 : vector<1x16xf32> to vector<1x16xf32>
    %46 = vector.broadcast %45 : vector<1x16xf32> to vector<16x16xf32>
    %c15_i32_7 = arith.constant 15 : i32
    %47 = tpu.dynamic_rotate %40 by %c15_i32_7 dim 0 : vector<16x16xf32>, i32 -> vector<16x16xf32>
    %c15_i32_8 = arith.constant 15 : i32
    %48 = vector.broadcast %c15_i32_8 : i32 to vector<16x16xi32>
    %49 = arith.cmpi sge, %1, %48 : vector<16x16xi32>
    %50 = arith.select %49, %46, %47 : vector<16x16xi1>, vector<16x16xf32>
    %c1_i32_9 = arith.constant 1 : i32
    %51 = tpu.dynamic_rotate %40 by %c1_i32_9 dim 0 : vector<16x16xf32>, i32 -> vector<16x16xf32>
    %c1_i32_10 = arith.constant 1 : i32
    %52 = vector.broadcast %c1_i32_10 : i32 to vector<16x16xi32>
    %53 = arith.cmpi slt, %1, %52 : vector<16x16xi32>
    %54 = arith.select %53, %43, %51 : vector<16x16xi1>, vector<16x16xf32>
    %55 = arith.addf %40, %50 : vector<16x16xf32>
    %56 = arith.addf %55, %54 : vector<16x16xf32>
    %cst_11 = arith.constant 0.333333343 : f32
    %57 = vector.broadcast %cst_11 : f32 to vector<16x16xf32>
    %58 = arith.mulf %56, %57 : vector<16x16xf32>
    %59 = arith.subf %40, %58 : vector<16x16xf32>
    %c0_12 = arith.constant 0 : index
    %c0_13 = arith.constant 0 : index
    %60 = vector.load %arg2[%c0_12, %c0_13] : memref<16x16xf32, #tpu.memory_space<vmem>>, vector<16x16xf32>
    tpu.vector_store %arg2[%c0_12, %c0_13], %59 {strides = array<i32>} : memref<16x16xf32, #tpu.memory_space<vmem>>, vector<16x16xf32>,
    %c0_14 = arith.constant 0 : index
    %c0_15 = arith.constant 0 : index
    %61 = vector.load %arg3[%c0_14, %c0_15] : memref<16x16xf32, #tpu.memory_space<vmem>>, vector<16x16xf32>
    tpu.vector_store %arg3[%c0_14, %c0_15], %39 {strides = array<i32>} : memref<16x16xf32, #tpu.memory_space<vmem>>, vector<16x16xf32>,
    %c0_16 = arith.constant 0 : index
    %c0_17 = arith.constant 0 : index
    %62 = vector.load %arg4[%c0_16, %c0_17] : memref<16x16xf32, #tpu.memory_space<vmem>>, vector<16x16xf32>
    tpu.vector_store %arg4[%c0_16, %c0_17], %58 {strides = array<i32>} : memref<16x16xf32, #tpu.memory_space<vmem>>, vector<16x16xf32>,
    return
  }
  func.func @transform_0(%arg0: i32) -> (i32, i32) {
    %c0_i32 = arith.constant 0 : i32
    %c0_i32_0 = arith.constant 0 : i32
    return %c0_i32, %arg0 : i32, i32
  }
  func.func @transform_1(%arg0: i32) -> (i32, i32) {
    %c0_i32 = arith.constant 0 : i32
    %c0_i32_0 = arith.constant 0 : i32
    return %c0_i32, %arg0 : i32, i32
  }
  func.func @transform_2(%arg0: i32) -> (i32, i32) {
    %c0_i32 = arith.constant 0 : i32
    %c0_i32_0 = arith.constant 0 : i32
    return %c0_i32, %arg0 : i32, i32
  }
  func.func @transform_3(%arg0: i32) -> (i32, i32) {
    %c0_i32 = arith.constant 0 : i32
    %c0_i32_0 = arith.constant 0 : i32
    return %c0_i32, %arg0 : i32, i32
  }
}

</mosaic_0001>

<bundles_post_ra>
// kernel: tpu_custom_call.1
= control target key start
LH: loop header
LB: loop body
LE: loop exit
PB: predicated region body
PF: predicated region fallthrough
CT: control target
= control target key end

     0   :  { %9 = vsyncpa [#allocation3], 0  ;;  %s406_s0 = inlined_call_operand.hbm [shape: f32[16,16], index: 0, kind: input, shape index: {}]   ;;  %s407_s1 = inlined_call_operand.hbm [shape: f32[16,16], index: 1, kind: output, shape index: {0}]   ;;  %s408_s2 = inlined_call_operand.hbm [shape: f32[16,16], index: 2, kind: output, shape index: {1}]   ;;  %s409_s3 = inlined_call_operand.hbm [shape: f32[16,16], index: 3, kind: output, shape index: {2}]  }
   0x1   :  { %10 = vsyncpa [#allocation4], 0 }
   0x2   :  { %11 = vsyncpa [#allocation7], 0  ;;  %s282_s12 = smov [#allocation2]  }
   0x3   :  { %s17_s13 = sshll.u32 %s282_s12, 4  ;;  %s18_s13 = int_to_ptr.vmem [resolvable:$true] %s17_s13 }
   0x4   :  { %s204_s14 = scalar_lea.vmem %s18_s13, 256  ;;  %p209_p1 = scmp.lt.s32.totalorder %s18_s13, %s18_s13 }
   0x5   :  { %p205_p0 = scmp.ne.s32.totalorder %s18_s13, %s204_s14  ;;  %p210_p2 = scmp.lt.s32.totalorder %s204_s14, %s204_s14 }
   0x7   :  { %p211_p3 = por %p210_p2, %p209_p1 }
   0x9   :  { %p212_p4 = pnand %p211_p3, %p205_p0 }
   0xb   :  { %215 = shalt.err (!%p212_p4)
}
   0xc   :  { %s283_s15 = smov 128   ;;  %s284_s16 = smov 8  }
   0xd   :  { %23 = dma.hbm_to_vmem [thread:$0]  %s406_s0, 256, %s18_s13, [#allocation3], %s283_s15, %s283_s15, %s284_s16  }
   0xe   :  { %276 = dma.done.wait [#allocation3], 256  }
   0xf   :  { %277 = vsyncadd [#allocation3], 4294967040  ;;  %v29_v0 = vlaneseq  ;;  %v27_v4 = vld [vmem:[#allocation2] sm:$0xff]  ;;  %v28_v5 = vld [vmem:[#allocation2 + $0x8] sm:$0xff]  ;;  %vm135_vm9 = vcmask 130048   ;;  %s285_s0 = smov [#allocation6]  }
  0x10   :  { %v40_v8 = vrot.slane %v27_v4, 1  ;;  %v41_v9 = vrot.slane %v28_v5, 1  ;;  %v49_v10 = vrot.slane %v27_v4, 7  ;;  %v50_v11 = vrot.slane %v28_v5, 7  ;;  %s159_s19 = sshll.u32 %s285_s0, 4  ;;  %s160_s19 = int_to_ptr.vmem [resolvable:$true] %s159_s19 }
  0x11   :  { %v314_v1 = vshrl.u32 %v29_v0, 7  ;;  %v61_v12 = vrot.slane %v27_v4, 2  ;;  %v62_v13 = vrot.slane %v28_v5, 2  ;;  %v70_v14 = vrot.slane %v27_v4, 6  ;;  %s216_s20 = scalar_lea.vmem %s160_s19, 256  ;;  %p221_p6 = scmp.lt.s32.totalorder %s160_s19, %s160_s19 }
  0x12   :  { %v71_v16 = vrot.slane %v28_v5, 6  ;;  %v82_v17 = vrot.slane %v27_v4, 3  ;;  %v83_v20 = vrot.slane %v28_v5, 3  ;;  %v91_v21 = vrot.slane %v27_v4, 5  ;;  %p217_p5 = scmp.ne.s32.totalorder %s160_s19, %s216_s20  ;;  %p222_p7 = scmp.lt.s32.totalorder %s216_s20, %s216_s20 }
  0x13   :  { %v34_v2 = vsub.s32 0, %v314_v1  ;;  %vm42_vm0 = vcmp.lt.s32.totalorder %v314_v1, 7  ;;  %vm51_vm1 = vcmp.lt.s32.totalorder %v314_v1, 1  ;;  %v320_v3 = vadd.s32 8, %v314_v1 }
  0x14   :  { %vm63_vm2 = vcmp.lt.s32.totalorder %v314_v1, 6  ;;  %vm72_vm3 = vcmp.lt.s32.totalorder %v314_v1, 2  ;;  %vm93_vm4 = vcmp.lt.s32.totalorder %v314_v1, 3  ;;  %v38_v6 = vsub.s32 7, %v314_v1  ;;  %p223_p8 = por %p222_p7, %p221_p6 }
  0x15   :  { %v35_v7 = vrot.slane %v27_v4, %v34_v2  ;;  %v43_v15 = vsel %vm42_vm0, %v40_v8, %v41_v9  ;;  %vm46_vm5 = vcmp.ge.s32.totalorder %v320_v3, 15  ;;  %v53_v18 = vsel %vm51_vm1, %v50_v11, %v49_v10 }
  0x16   :  { %v57_v19 = vadd.f32 %v43_v15, %v27_v4  ;;  %v64_v23 = vsel %vm63_vm2, %v61_v12, %v62_v13  ;;  %v74_v24 = vsel %vm72_vm3, %v71_v16, %v70_v14  ;;  %v92_v25 = vrot.slane %v28_v5, 5  ;;  %p224_p9 = pnand %p223_p8, %p217_p5 }
  0x17   :  { %v55_v22 = vsel %vm51_vm1, %v35_v7, %v53_v18  ;;  %vm84_vm6 = vcmp.lt.s32.totalorder %v314_v1, 5  ;;  %v39_v27 = vrot.slane %v28_v5, %v38_v6  ;;  %v44_v28 = vsel %vm42_vm0, %v41_v9, %v40_v8 }
  0x18   :  { %v59_v26 = vadd.f32 %v57_v19, %v55_v22  ;;  %v76_v29 = vsel %vm72_vm3, %v35_v7, %v74_v24  ;;  %v65_v30 = vsel %vm63_vm2, %v62_v13, %v61_v12  ;;  %vm67_vm7 = vcmp.ge.s32.totalorder %v320_v3, 14 }
  0x19   :  { %v95_v32 = vsel %vm93_vm4, %v92_v25, %v91_v21  ;;  %v48_v33 = vsel %vm46_vm5, %v39_v27, %v44_v28  ;;  %v52_v34 = vsel %vm51_vm1, %v49_v10, %v50_v11  ;;  %v85_v35 = vsel %vm84_vm6, %v82_v17, %v83_v20 }
  0x1a   :  { %v78_v31 = vadd.f32 %v64_v23, %v59_v26  ;;  %v58_v36 = vadd.f32 %v48_v33, %v28_v5  ;;  %v69_v38 = vsel %vm67_vm7, %v39_v27, %v65_v30  ;;  %v97_v39 = vsel %vm93_vm4, %v35_v7, %v95_v32 }
  0x1b   :  { %v86_v41 = vsel %vm84_vm6, %v83_v20, %v82_v17  ;;  %vm88_vm8 = vcmp.ge.s32.totalorder %v320_v3, 13  ;;  %v73_v43 = vsel %vm72_vm3, %v70_v14, %v71_v16  ;;  %v94_v49 = vsel %vm93_vm4, %v91_v21, %v92_v25 }
  0x1c   :  { %v80_v37 = vadd.f32 %v78_v31, %v76_v29  ;;  %v60_v40 = vadd.f32 %v58_v36, %v52_v34  ;;  %v90_v46 = vsel %vm88_vm8, %v39_v27, %v86_v41 }
  0x1e   :  { %v99_v42 = vadd.f32 %v85_v35, %v80_v37  ;;  %v79_v44 = vadd.f32 %v69_v38, %v60_v40 }
  0x20   :  { %v101_v45 = vadd.f32 %v99_v42, %v97_v39  ;;  %v81_v47 = vadd.f32 %v79_v44, %v73_v43 }
  0x22   :  { %v103_v48 = vmul.f32 0.14285715, %v101_v45  ;;  %v100_v50 = vadd.f32 %v90_v46, %v81_v47 }
  0x24   :  { %138 = vst.msk [vmem:[#allocation6] sm:$0xff] %vm135_vm9, %v103_v48  ;;  %v105_v51 = vsub.f32 %v27_v4, %v103_v48  ;;  %v102_v52 = vadd.f32 %v100_v50, %v94_v49 }
  0x26   :  { %v104_v53 = vmul.f32 0.14285715, %v102_v52  ;;  %v115_v55 = vrot.slane %v105_v51, 1  ;;  %v121_v56 = vrot.slane %v105_v51, 7  ;;  %v110_v57 = vrot.slane %v105_v51, %v34_v2 }
  0x28   :  { %v106_v54 = vsub.f32 %v28_v5, %v104_v53  ;;  %139 = vst.msk [vmem:[#allocation6 + $0x8] sm:$0xff] %vm135_vm9, %v104_v53 }
  0x29   :  { %227 = shalt.err (!%p224_p9)
}
  0x2a   :  { %165 = dma.vmem_to_hbm [thread:$0]  %s160_s19, 256, %s408_s2, [#allocation7], %s283_s15, %s283_s15, %s284_s16   ;;  %v116_v58 = vrot.slane %v106_v54, 1  ;;  %v122_v59 = vrot.slane %v106_v54, 7  ;;  %v114_v60 = vrot.slane %v106_v54, %v38_v6 }
  0x2b   :  { %s286_s2 = smov [#allocation8]   ;;  %s287_s24 = smov [#allocation5]  }
  0x2c   :  { %v117_v61 = vsel %vm42_vm0, %v115_v55, %v116_v58  ;;  %v124_v62 = vsel %vm51_vm1, %v122_v59, %v121_v56  ;;  %v118_v63 = vsel %vm42_vm0, %v116_v58, %v115_v55  ;;  %v123_v5 = vsel %vm51_vm1, %v121_v56, %v122_v59  ;;  %s171_s23 = sshll.u32 %s286_s2, 4  ;;  %s147_s25 = sshll.u32 %s287_s24, 4  ;;  %s172_s23 = int_to_ptr.vmem [resolvable:$true] %s171_s23  ;;  %s148_s25 = int_to_ptr.vmem [resolvable:$true] %s147_s25 }
  0x2d   :  { %v125_v0 = vsel %vm51_vm1, %v110_v57, %v124_v62  ;;  %v127_v2 = vadd.f32 %v117_v61, %v105_v51  ;;  %v120_v4 = vsel %vm46_vm5, %v114_v60, %v118_v63  ;;  %s236_s26 = scalar_lea.vmem %s172_s23, 256  ;;  %p241_p11 = scmp.lt.s32.totalorder %s172_s23, %s172_s23 }
  0x2e   :  { %v128_v6 = vadd.f32 %v120_v4, %v106_v54  ;;  %p237_p10 = scmp.ne.s32.totalorder %s172_s23, %s236_s26  ;;  %p242_p12 = scmp.lt.s32.totalorder %s236_s26, %s236_s26 }
  0x2f   :  { %v129_v7 = vadd.f32 %v127_v2, %v125_v0 }
  0x30   :  { %v130_v8 = vadd.f32 %v128_v6, %v123_v5  ;;  %p243_p13 = por %p242_p12, %p241_p11 }
  0x31   :  { %v131_v9 = vmul.f32 0.33333334, %v129_v7 }
  0x32   :  { %v132_v10 = vmul.f32 0.33333334, %v130_v8  ;;  %p244_p0 = pnand %p243_p13, %p237_p10 }
  0x33   :  { %v133_v11 = vsub.f32 %v105_v51, %v131_v9  ;;  %140 = vst.msk [vmem:[#allocation8] sm:$0xff] %vm135_vm9, %v131_v9 }
  0x34   :  { %v134_v12 = vsub.f32 %v106_v54, %v132_v10  ;;  %141 = vst.msk [vmem:[#allocation8 + $0x8] sm:$0xff] %vm135_vm9, %v132_v10 }
  0x35   :  { %136 = vst.msk [vmem:[#allocation5] sm:$0xff] %vm135_vm9, %v133_v11 }
  0x36   :  { %247 = shalt.err (!%p244_p0)
}
  0x37   :  { %177 = dma.vmem_to_hbm [thread:$0]  %s172_s23, 256, %s409_s3, [#allocation7], %s283_s15, %s283_s15, %s284_s16   ;;  %137 = vst.msk [vmem:[#allocation5 + $0x8] sm:$0xff] %vm135_vm9, %v134_v12 }
  0x38   :  { %s256_s29 = scalar_lea.vmem %s148_s25, 256  ;;  %p261_p2 = scmp.lt.s32.totalorder %s148_s25, %s148_s25 }
  0x39   :  { %p257_p1 = scmp.ne.s32.totalorder %s148_s25, %s256_s29  ;;  %p262_p3 = scmp.lt.s32.totalorder %s256_s29, %s256_s29 }
  0x3b   :  { %p263_p4 = por %p262_p3, %p261_p2 }
  0x3d   :  { %p264_p5 = pnand %p263_p4, %p257_p1 }
  0x3f   :  { %267 = shalt.err (!%p264_p5)
}
  0x40   :  { %153 = dma.vmem_to_hbm [thread:$0]  %s148_s25, 256, %s407_s1, [#allocation4], %s283_s15, %s283_s15, %s284_s16  }
  0x41   :  { %278 = dma.done.wait [#allocation4], 256  }
  0x42   :  { %279 = vsyncadd [#allocation4], 4294967040 }
  0x43   :  { %280 = dma.done.wait [#allocation7], 512  }
  0x44   :  { %281 = vsyncadd [#allocation7], 4294966784 }
  0x45   :  { %187 = vsyncpa [#allocation3], 1 }
  0x46   :  { %188 = vsyncpa [#allocation4], 1 }
  0x47   :  { %189 = vsyncpa [#allocation7], 1 }

</bundles_post_ra>
